<compile_context>
chip_gen: v6e
topology: v6e:2x2x1
jax: 0.10.0
libtpu: 0.0.40
codegen_flags: <defaults>
</compile_context>

<pallas_src>
import jax
import jax.numpy as jnp
from jax.experimental import pallas as pl
from jax.experimental.pallas import tpu as pltpu


# ----------------------------------------------------------------------------
# Helpers
# ----------------------------------------------------------------------------

def _round_up(x, m):
    return ((x + m - 1) // m) * m


def _vmem_capacity_bytes():
    """Physical per-TensorCore VMEM; conservative v7x value if unavailable."""
    try:
        info = pltpu.get_tpu_info()
        cap = getattr(info, "vmem_capacity_bytes", None)
        if cap:
            return int(cap)
    except Exception:
        pass
    return 64 << 20


def _resident_need_bytes(tb, V, E, x_item, w_item):
    return (2 * tb * V * x_item        # double-buffered logits tile
            + 2 * tb * E * 4           # double-buffered f32 output tile
            + V * E * w_item           # resident (single-buffered) W
            + tb * V * (8 + w_item)    # in-kernel f32 x/e + cast-to-W temporaries
            + tb * E * 4)              # f32 matmul result temp


def _tiled_need_bytes(tb, tv, E, x_item, w_item):
    return (2 * tb * tv * x_item       # double-buffered logits tile
            + 2 * tv * E * w_item      # double-buffered W tile
            + 2 * tb * E * 4           # double-buffered f32 output tile
            + tb * E * 4 + 2 * tb * 4  # acc / m / l scratch
            + tb * tv * (8 + w_item)   # in-kernel temporaries
            + tb * E * 4)              # f32 matmul partial product


def _pick_tb_resident(B, V, E, x_item, w_item, budget):
    tb = min(256, _round_up(B, 8))
    while tb > 8 and _resident_need_bytes(tb, V, E, x_item, w_item) > budget:
        tb = max(8, _round_up(tb // 2, 8))
    if _resident_need_bytes(tb, V, E, x_item, w_item) > budget:
        return None                                     # fall back to tiled path
    # Feed both v7x TensorCores: make the parallel batch axis >= 2 steps.
    if B > 8 and pl.cdiv(B, tb) < 2:
        tb = max(8, _round_up(pl.cdiv(B, 2), 8))
    return tb


def _pick_tiles_vocab(B, V, E, x_item, w_item, budget):
    tb = min(256, _round_up(B, 8))
    tv = min(_round_up(V, 128), 2048)
    while _tiled_need_bytes(tb, tv, E, x_item, w_item) > budget:
        if tv > 128:
            tv = max(128, _round_up(tv // 2, 128))
        elif tb > 8:
            tb = max(8, _round_up(tb // 2, 8))
        else:
            break
    if B > 8 and pl.cdiv(B, tb) < 2:
        tb = max(8, _round_up(pl.cdiv(B, 2), 8))
    return tb, tv


def _refined_reciprocal(denom):
    r = pl.reciprocal(denom, approx=True)       # EUP slot
    return r * (2.0 - denom * r)                # one Newton step -> f32 accuracy


# ----------------------------------------------------------------------------
# Kernel bodies
# ----------------------------------------------------------------------------

def _resident_kernel(x_ref, w_ref, o_ref):
    # x_ref: [tb, V] logits tile; w_ref: [V, E] resident weights.
    x = x_ref[...].astype(jnp.float32)
    m = jnp.max(x, axis=-1, keepdims=True)
    e = jnp.exp(x - m)                                      # softmax numerator
    denom = jnp.sum(e, axis=-1, keepdims=True)              # [tb, 1]
    acc = jnp.dot(e.astype(w_ref.dtype), w_ref[...],
                  preferred_element_type=jnp.float32)       # [tb, E] f32
    o_ref[...] = (acc * _refined_reciprocal(denom)).astype(o_ref.dtype)


def _make_vocab_tiled_kernel(V, tv):
    mask_cols = (V % tv) != 0

    def kernel(x_ref, w_ref, o_ref, m_sc, l_sc, acc_sc):
        k = pl.program_id(1)

        @pl.when(k == 0)
        def _():
            m_sc[...] = jnp.full_like(m_sc, -jnp.inf)
            l_sc[...] = jnp.zeros_like(l_sc)
            acc_sc[...] = jnp.zeros_like(acc_sc)

        x = x_ref[...].astype(jnp.float32)
        if mask_cols:
            col = jax.lax.broadcasted_iota(jnp.int32, x.shape, 1) + k * tv
            x = jnp.where(col < V, x, -jnp.inf)

        m_prev = m_sc[...]
        m_new = jnp.maximum(m_prev, jnp.max(x, axis=-1, keepdims=True))
        alpha = jnp.exp(m_prev - m_new)
        p = jnp.exp(x - m_new)
        l_sc[...] = alpha * l_sc[...] + jnp.sum(p, axis=-1, keepdims=True)
        acc_sc[...] = alpha * acc_sc[...] + jnp.dot(
            p.astype(w_ref.dtype), w_ref[...], preferred_element_type=jnp.float32)
        m_sc[...] = m_new

        @pl.when(k == pl.num_programs(1) - 1)
        def _():
            denom = l_sc[...]
            o_ref[...] = (acc_sc[...] * _refined_reciprocal(denom)).astype(o_ref.dtype)

    return kernel


# ----------------------------------------------------------------------------
# pallas_call wrappers
# ----------------------------------------------------------------------------

def _call_resident(x, w, tb, vmem_cap):
    B, V = x.shape
    _, E = w.shape
    x_item = jnp.dtype(x.dtype).itemsize
    w_item = jnp.dtype(w.dtype).itemsize

    grid = (pl.cdiv(B, tb),)
    need = _resident_need_bytes(tb, V, E, x_item, w_item)
    vmem_limit = min(max(int(need * 1.25), 32 << 20), vmem_cap)

    cost = pl.CostEstimate(
        flops=2 * B * V * E,
        transcendentals=B * V,
        bytes_accessed=B * V * x_item + V * E * w_item + B * E * 4,
    )

    def call(w_pipeline_mode):
        return pl.pallas_call(
            _resident_kernel,
            out_shape=jax.ShapeDtypeStruct((B, E), jnp.float32),
            grid_spec=pltpu.PrefetchScalarGridSpec(
                num_scalar_prefetch=0,
                grid=grid,
                in_specs=[
                    pl.BlockSpec((tb, V), lambda i: (i, 0)),           # logits tile
                    pl.BlockSpec((V, E), lambda i: (0, 0),             # resident W
                                 pipeline_mode=w_pipeline_mode),
                ],
                out_specs=pl.BlockSpec((tb, E), lambda i: (i, 0)),
            ),
            compiler_params=pltpu.CompilerParams(
                dimension_semantics=("parallel",),
                vmem_limit_bytes=vmem_limit,
            ),
            cost_estimate=cost,
        )(x, w)

    # W's index_map is constant across the grid -> single-buffer it (halves its
    # VMEM footprint). Fall back to default pipelining if unsupported.
    try:
        return call(pl.Buffered(1))
    except Exception:
        return call(None)


def _call_vocab_tiled(x, w, tb, tv, vmem_cap):
    B, V = x.shape
    _, E = w.shape
    x_item = jnp.dtype(x.dtype).itemsize
    w_item = jnp.dtype(w.dtype).itemsize

    v_pad = pl.cdiv(V, tv) * tv
    if v_pad != V:
        # Zero-pad W rows so undefined tail columns can never reach the
        # accumulator through the matmul (their probabilities are masked to 0
        # in-kernel, and 0 * 0 stays 0). One-time pass over the weights only.
        w = jnp.pad(w, ((0, v_pad - V), (0, 0)))

    grid = (pl.cdiv(B, tb), v_pad // tv)
    need = _tiled_need_bytes(tb, tv, E, x_item, w_item)
    vmem_limit = min(max(int(need * 1.25), 32 << 20), vmem_cap)

    cost = pl.CostEstimate(
        flops=2 * B * v_pad * E,
        transcendentals=B * v_pad,
        bytes_accessed=B * V * x_item + v_pad * E * w_item + B * E * 4,
    )

    return pl.pallas_call(
        _make_vocab_tiled_kernel(V, tv),
        out_shape=jax.ShapeDtypeStruct((B, E), jnp.float32),
        grid_spec=pltpu.PrefetchScalarGridSpec(
            num_scalar_prefetch=0,
            grid=grid,
            in_specs=[
                pl.BlockSpec((tb, tv), lambda i, k: (i, k)),   # logits tile
                pl.BlockSpec((tv, E), lambda i, k: (k, 0)),    # W tile
            ],
            out_specs=pl.BlockSpec((tb, E), lambda i, k: (i, 0)),
            scratch_shapes=[
                pltpu.VMEM((tb, 1), jnp.float32),   # running max
                pltpu.VMEM((tb, 1), jnp.float32),   # running denom
                pltpu.VMEM((tb, E), jnp.float32),   # output accumulator
            ],
        ),
        compiler_params=pltpu.CompilerParams(
            dimension_semantics=("parallel", "arbitrary"),
            vmem_limit_bytes=vmem_limit,
        ),
        cost_estimate=cost,
    )(x, w)


# ----------------------------------------------------------------------------
# Public entry point (forward pass of ApproxEmbedding)
# ----------------------------------------------------------------------------

def approx_embedding(inputs, embed_w, *, tb=None, tv=None,
                     force_vocab_tiling=False, mxu_dtype=None):
    """inputs: [1, batch, vocab]; embed_w: [vocab, embed_dim].
    Returns softmax(inputs.squeeze(0), axis=1) @ embed_w as [1, batch, embed_dim] f32.
    mxu_dtype: optionally cast W (and the MXU operands) to e.g. jnp.bfloat16
    for full-rate bf16 MXU on v6e/v7x (opt-in; slightly lower precision)."""
    assert inputs.shape[0] == 1
    x = inputs[0]                                     # squeeze(0) -> [B, V]
    B, V = x.shape
    Vw, E = embed_w.shape
    assert V == Vw

    if mxu_dtype is not None:
        embed_w = embed_w.astype(mxu_dtype)

    x_item = jnp.dtype(x.dtype).itemsize
    w_item = jnp.dtype(embed_w.dtype).itemsize

    vmem_phys = _vmem_capacity_bytes()
    budget = int(vmem_phys * 0.65)    # ~41 MiB on v7x (64 MiB VMEM), ~83 MiB on v5e/v6e
    vmem_cap = int(vmem_phys * 0.9)   # never request more than physical VMEM

    use_tiled = force_vocab_tiling
    tb_res = None
    if not use_tiled:
        if tb is not None:
            tb_res = tb
        else:
            tb_res = _pick_tb_resident(B, V, E, x_item, w_item, budget)
            if tb_res is None:
                use_tiled = True

    if not use_tiled:
        out = _call_resident(x, embed_w, tb_res, vmem_cap)
    else:
        tb_t, tv_t = _pick_tiles_vocab(B, V, E, x_item, w_item, budget)
        if tb is not None:
            tb_t = tb
        if tv is not None:
            tv_t = max(128, _round_up(tv, 128))
        out = _call_vocab_tiled(x, embed_w, tb_t, tv_t, vmem_cap)

    return out[None, :, :]                            # unsqueeze(0)


def _reference(inputs, embed_w):
    x = inputs[0].astype(jnp.float32)
    p = jax.nn.softmax(x, axis=1)
    return (p @ embed_w.astype(jnp.float32))[None, :, :]


if __name__ == "__main__":
    key = jax.random.PRNGKey(0)
    k_x, k_w, k_x2, k_w2 = jax.random.split(key, 4)

    # Small shapes consistent with the module; batch deliberately NOT a
    # multiple of 8 so the partial-block (masked read/write) path is exercised.
    batch, vocab, embed_dim = 20, 256, 128
    embed_w = jax.random.normal(k_w, (vocab, embed_dim), dtype=jnp.float32)
    inputs = jax.random.normal(k_x, (1, batch, vocab), dtype=jnp.float32)

    out = jax.block_until_ready(approx_embedding(inputs, embed_w))
    ref = _reference(inputs, embed_w)
    assert out.shape == (1, batch, embed_dim)
    assert jnp.allclose(out, ref, atol=1e-4, rtol=1e-4)

    # Also validate the vocab-tiled online-softmax path (used when [V, E] does
    # not fit VMEM); vocab chosen NOT a multiple of the vocab tile so the
    # in-kernel column masking + weight zero-padding is exercised too.
    vocab2 = 200
    embed_w2 = jax.random.normal(k_w2, (vocab2, embed_dim), dtype=jnp.float32)
    inputs2 = jax.random.normal(k_x2, (1, batch, vocab2), dtype=jnp.float32)
    out2 = jax.block_until_ready(
        approx_embedding(inputs2, embed_w2, force_vocab_tiling=True, tv=128))
    ref2 = _reference(inputs2, embed_w2)
    assert out2.shape == (1, batch, embed_dim)
    assert jnp.allclose(out2, ref2, atol=1e-4, rtol=1e-4)

    print("KERNEL_OK")
</pallas_src>

<mosaic_0001>
module attributes {stable_mosaic.version = 11 : i64} {
  func.func @_resident_kernel(%arg0: i32, %arg1: memref<16x256xf32, #tpu.memory_space<vmem>>, %arg2: memref<256x128xf32, #tpu.memory_space<vmem>>, %arg3: memref<16x128xf32, #tpu.memory_space<vmem>>) attributes {dimension_semantics = [#tpu.dimension_semantics<parallel>], iteration_bounds = array<i64: 2>, scalar_prefetch = 0 : i64, scratch_operands = 0 : i64, tpu.core_type = #tpu.core_type<tc>, window_params = [{transform_indices = @transform_0, window_bounds = array<i64: 16, 256>}, {pipeline_mode = #tpu.pipeline_mode<synchronous>, transform_indices = @transform_1, window_bounds = array<i64: 256, 128>}, {transform_indices = @transform_2, window_bounds = array<i64: 16, 128>}]} {
    %c0 = arith.constant 0 : index
    %c0_0 = arith.constant 0 : index
    %0 = vector.load %arg1[%c0, %c0_0] : memref<16x256xf32, #tpu.memory_space<vmem>>, vector<16x256xf32>
    %cst = arith.constant dense<0xFF800000> : vector<16xf32>
    %1 = vector.multi_reduction <maximumf>, %0, %cst [1] : vector<16x256xf32> to vector<16xf32>
    %2 = vector.shape_cast %1 : vector<16xf32> to vector<16x1xf32>
    %3 = vector.broadcast %2 : vector<16x1xf32> to vector<16x256xf32>
    %4 = arith.subf %0, %3 : vector<16x256xf32>
    %5 = math.exp %4 : vector<16x256xf32>
    %cst_1 = arith.constant dense<0.000000e+00> : vector<16xf32>
    %6 = vector.multi_reduction <add>, %5, %cst_1 [1] : vector<16x256xf32> to vector<16xf32>
    %7 = vector.shape_cast %6 : vector<16xf32> to vector<16x1xf32>
    %c0_2 = arith.constant 0 : index
    %c0_3 = arith.constant 0 : index
    %8 = vector.load %arg2[%c0_2, %c0_3] : memref<256x128xf32, #tpu.memory_space<vmem>>, vector<256x128xf32>
    %cst_4 = arith.constant dense<0.000000e+00> : vector<16x128xf32>
    %9 = tpu.matmul %5, %8, %cst_4 {dimension_numbers = #tpu.dot_dimension_numbers<[1], [0], [0], [1], [0, 0, 1, 1], [], []>} : vector<16x256xf32>, vector<256x128xf32>, vector<16x128xf32> -> vector<16x128xf32>
    %10 = tpu.reciprocal %7 {approx = true} : vector<16x1xf32> -> vector<16x1xf32>
    %11 = arith.mulf %7, %10 : vector<16x1xf32>
    %cst_5 = arith.constant 2.000000e+00 : f32
    %12 = vector.broadcast %cst_5 : f32 to vector<16x1xf32>
    %13 = arith.subf %12, %11 : vector<16x1xf32>
    %14 = arith.mulf %10, %13 : vector<16x1xf32>
    %15 = vector.broadcast %14 : vector<16x1xf32> to vector<16x128xf32>
    %16 = arith.mulf %9, %15 : vector<16x128xf32>
    %c0_6 = arith.constant 0 : index
    %c0_7 = arith.constant 0 : index
    %17 = vector.load %arg3[%c0_6, %c0_7] : memref<16x128xf32, #tpu.memory_space<vmem>>, vector<16x128xf32>
    tpu.vector_store %arg3[%c0_6, %c0_7], %16 {strides = array<i32>} : memref<16x128xf32, #tpu.memory_space<vmem>>, vector<16x128xf32>,
    return
  }
  func.func @transform_0(%arg0: i32) -> (i32, i32) {
    %c0_i32 = arith.constant 0 : i32
    %c0_i32_0 = arith.constant 0 : i32
    return %arg0, %c0_i32 : i32, i32
  }
  func.func @transform_1(%arg0: i32) -> (i32, i32) {
    %c0_i32 = arith.constant 0 : i32
    %c0_i32_0 = arith.constant 0 : i32
    %c0_i32_1 = arith.constant 0 : i32
    return %c0_i32, %c0_i32_0 : i32, i32
  }
  func.func @transform_2(%arg0: i32) -> (i32, i32) {
    %c0_i32 = arith.constant 0 : i32
    %c0_i32_0 = arith.constant 0 : i32
    return %arg0, %c0_i32 : i32, i32
  }
}

module attributes {stable_mosaic.version = 11 : i64} {
  func.func @_resident_kernel(%arg0: i32, %arg1: memref<16x256xf32, #tpu.memory_space<vmem>>, %arg2: memref<256x128xf32, #tpu.memory_space<vmem>>, %arg3: memref<16x128xf32, #tpu.memory_space<vmem>>) attributes {dimension_semantics = [#tpu.dimension_semantics<parallel>], iteration_bounds = array<i64: 2>, scalar_prefetch = 0 : i64, scratch_operands = 0 : i64, tpu.core_type = #tpu.core_type<tc>, window_params = [{transform_indices = @transform_0, window_bounds = array<i64: 16, 256>}, {pipeline_mode = #tpu.pipeline_mode<synchronous>, transform_indices = @transform_1, window_bounds = array<i64: 256, 128>}, {transform_indices = @transform_2, window_bounds = array<i64: 16, 128>}]} {
    %c0 = arith.constant 0 : index
    %c0_0 = arith.constant 0 : index
    %0 = vector.load %arg1[%c0, %c0_0] : memref<16x256xf32, #tpu.memory_space<vmem>>, vector<16x256xf32>
    %cst = arith.constant dense<0xFF800000> : vector<16xf32>
    %1 = vector.multi_reduction <maximumf>, %0, %cst [1] : vector<16x256xf32> to vector<16xf32>
    %2 = vector.shape_cast %1 : vector<16xf32> to vector<16x1xf32>
    %3 = vector.broadcast %2 : vector<16x1xf32> to vector<16x256xf32>
    %4 = arith.subf %0, %3 : vector<16x256xf32>
    %5 = math.exp %4 : vector<16x256xf32>
    %cst_1 = arith.constant dense<0.000000e+00> : vector<16xf32>
    %6 = vector.multi_reduction <add>, %5, %cst_1 [1] : vector<16x256xf32> to vector<16xf32>
    %7 = vector.shape_cast %6 : vector<16xf32> to vector<16x1xf32>
    %c0_2 = arith.constant 0 : index
    %c0_3 = arith.constant 0 : index
    %8 = vector.load %arg2[%c0_2, %c0_3] : memref<256x128xf32, #tpu.memory_space<vmem>>, vector<256x128xf32>
    %cst_4 = arith.constant dense<0.000000e+00> : vector<16x128xf32>
    %9 = tpu.matmul %5, %8, %cst_4 {dimension_numbers = #tpu.dot_dimension_numbers<[1], [0], [0], [1], [0, 0, 1, 1], [], []>} : vector<16x256xf32>, vector<256x128xf32>, vector<16x128xf32> -> vector<16x128xf32>
    %10 = tpu.reciprocal %7 {approx = true} : vector<16x1xf32> -> vector<16x1xf32>
    %11 = arith.mulf %7, %10 : vector<16x1xf32>
    %cst_5 = arith.constant 2.000000e+00 : f32
    %12 = vector.broadcast %cst_5 : f32 to vector<16x1xf32>
    %13 = arith.subf %12, %11 : vector<16x1xf32>
    %14 = arith.mulf %10, %13 : vector<16x1xf32>
    %15 = vector.broadcast %14 : vector<16x1xf32> to vector<16x128xf32>
    %16 = arith.mulf %9, %15 : vector<16x128xf32>
    %c0_6 = arith.constant 0 : index
    %c0_7 = arith.constant 0 : index
    %17 = vector.load %arg3[%c0_6, %c0_7] : memref<16x128xf32, #tpu.memory_space<vmem>>, vector<16x128xf32>
    tpu.vector_store %arg3[%c0_6, %c0_7], %16 {strides = array<i32>} : memref<16x128xf32, #tpu.memory_space<vmem>>, vector<16x128xf32>,
    return
  }
  func.func @transform_0(%arg0: i32) -> (i32, i32) {
    %c0_i32 = arith.constant 0 : i32
    %c0_i32_0 = arith.constant 0 : i32
    return %arg0, %c0_i32 : i32, i32
  }
  func.func @transform_1(%arg0: i32) -> (i32, i32) {
    %c0_i32 = arith.constant 0 : i32
    %c0_i32_0 = arith.constant 0 : i32
    %c0_i32_1 = arith.constant 0 : i32
    return %c0_i32, %c0_i32_0 : i32, i32
  }
  func.func @transform_2(%arg0: i32) -> (i32, i32) {
    %c0_i32 = arith.constant 0 : i32
    %c0_i32_0 = arith.constant 0 : i32
    return %arg0, %c0_i32 : i32, i32
  }
}

</mosaic_0001>

<bundles_post_ra>
// kernel: tpu_custom_call.1
= control target key start
LH: loop header
LB: loop body
LE: loop exit
PB: predicated region body
PF: predicated region fallthrough
CT: control target
= control target key end

     0   :  { %7 = vsyncpa [#allocation3], 0  ;;  %s970_s0 = inlined_call_operand.hbm [shape: f32[20,256], index: 0, kind: input, shape index: {}]   ;;  %s971_s1 = inlined_call_operand.hbm [shape: f32[256,128], index: 1, kind: input, shape index: {}]   ;;  %s972_s2 = inlined_call_operand.hbm [shape: f32[20,128], index: 2, kind: output, shape index: {}]  }
   0x1   :  { %9 = vsyncpa [#allocation3 + $0x1], 0 }
   0x2   :  { %10 = vsyncpa [#allocation6], 0 }
   0x3   :  { %11 = vsyncpa [#allocation4], 0 }
   0x4   :  { %13 = vsyncpa [#allocation4 + $0x1], 0  ;;  %s760_s9 = smov 0   ;;  %s762_s10 = smov 0  }
   0x5   :  { %s764_s11 = smov 0   ;;  %s766_s12 = smov 0  }
   0x6 LB: > { %s781_s13 = sadd.s32 4294967295, %s734_s12   ;;  %s446_s14 = sadd.s32 4294967294, %s734_s12   ;;  %s734_s12 = sphi %s766_s12, %s987_s12   ;;  %s730_s11 = sphi %s764_s11, %s986_s11   ;;  %s726_s10 = sphi %s762_s10, %s985_s10   ;;  %s722_s9 = sphi %s760_s9, %s984_s9  }
   0x7   : > { %s785_s15 = sadd.s32 1, %s734_s12   ;;  %s26_s16 = sadd.s32 1, %s730_s11 }
   0x8   : > { %s23_s17 = ssub.s32 %s734_s12, %s785_s15  ;;  %p33_p0 = scmp.ne.s32.totalorder %s730_s11, %s726_s10 }
   0x9   : > { %p24_p1 = scmp.eq.s32.totalorder %s23_s17, 0  ;;  %p34_p2 = scmp.eq.s32.totalorder %s734_s12, 0 }
   0xa   : > { %p39_p3 = scmp.ne.s32.totalorder %s726_s10, %s722_s9  ;;  %p40_p4 = scmp.eq.s32.totalorder %s781_s13, 0 }
   0xb   : > { %s797_s18 = scalar_select %p24_p1, %s730_s11, %s26_s16  }
   0xc   : > { %p799_p5 = por %p34_p2, %p33_p0  ;;  %p805_p6 = por %p40_p4, %p39_p3 }
   0xd   : > { %p84_p7 = scmp.eq.s32.totalorder %s781_s13, 1  ;;  %p90_p8 = scmp.eq.s32.totalorder %s446_s14, 1 }
   0xe   : > { %s976_s20 = scalar_select %p805_p6, 1, 0 }
   0xf   : > { %p447_p9 = scmp.ge.s32.totalorder %s734_s12, 1  ;;  %p97_p10 = scmp.lt.s32.totalorder %s734_s12, 3 }
  0x10   : > { %p812_p11 = por %p84_p7, %p33_p0  ;;  %p816_p12 = por %p90_p8, %p39_p3 }
  0x11   : > { %p820_p13 = pnand %p447_p9, %p97_p10  ;;  %s736_s24 = smov [#allocation5]  }
  0x12   : > { %s977_s21 = scalar_select %p812_p11, 1, 0 }
  0x13   : > { %s978_s22 = scalar_select %p816_p12, 1, 0 }
  0x14   : > { %p552_p1 = pneg %p820_p13  ;;  %s109_s25 = sshll.u32 %s736_s24, 4  ;;  %s110_s25 = int_to_ptr.vmem [resolvable:$true] %s109_s25 }
  0x15   : > { %s625_s26 = scalar_lea.vmem %s110_s25, 4096  ;;  %p633_p8 = scmp.lt.s32.totalorder %s110_s25, %s110_s25 }
  0x16   : > { %p553_p2 = pnand %p552_p1, %p40_p4  ;;  %p626_p7 = scmp.ne.s32.totalorder %s110_s25, %s625_s26 }
  0x17   : > { %p634_p6 = scmp.lt.s32.totalorder %s625_s26, %s625_s26 }
  0x18   : > { %p616_p0 = pneg %p553_p2 }
  0x19   : > { %p635_p12 = por %p634_p6, %p633_p8 }
  0x1a   : > { %p628_p11 = pnand %p626_p7, %p616_p0 }
  0x1c   : > { %p629_p3 = pneg %p628_p11 }
  0x1e   : > { %p636_p9 = pnand %p635_p12, %p629_p3 }
  0x20   : > { %639 = shalt.err (!%p636_p9)
}
  0x21   : > { %s737_s27 = smov 128   ;;  %s738_s28 = smov 8  }
  0x22   : > { %555 = dma.hbm_to_vmem [thread:$0]  (!%p553_p2), %s971_s1, 4096, %s110_s25, [#allocation6], %s737_s27, %s737_s27, %s738_s28  }
  0x23   : > { %p974_p10 = scmp.ge.s32.totalorder %s734_s12, 2 }
  0x25   : > { %119 = sbr.rel (%p974_p10) target bundleno = 74 (0x4a), region = 20 }
  0x2a   : > { %122 = sbr.rel (!%p799_p5) target bundleno = 74 (0x4a), region = 24  ;;  %s123_s3 = sand.u32 (%p799_p5), 1, %s730_s11  }
  0x2b   : > { %s451_s4 = sshll.u32 (%p799_p5), %s734_s12, 1  ;;  %s450_s5 = sshll.u32 (%p799_p5), %s123_s3, 5 }
  0x2c   : > { %s129_s6 = ssub.s32 (%p799_p5), 3, %s451_s4  ;;  %s841_s14 = scalar_lea.sflag (%p799_p5), [#allocation3], %s123_s3 }
  0x2d   : > { %p130_p6 = scmp.lt.s32.totalorder (%p799_p5), %s129_s6, 2  ;;  %s127_s16 = scalar_lea.vmem (%p799_p5), [#allocation2], %s450_s5 }
  0x2f   : > { %s989_s6 = smov (!%p130_p6, %s129_s6), 2 }
  0x30   : > { %s838_s7 = sshll.u32 %s989_s6, 8 }
  0x31   : > { %s135_s8 = ssub.s32 512, %s838_s7 }
  0x32   : > { %136 = vsyncadd %s841_s14, %s135_s8  ;;  %p454_p5 = scmp.ne.s32.totalorder %s838_s7, 0  ;;  %s474_s17 = sshll.u32 %s734_s12, 9 }
  0x33   : > { %s849_s25 = scalar_lea.hbm %s970_s0, %s474_s17  ;;  %s142_s26 = sshll.u32 %s127_s16, 4  ;;  %s851_s26 = int_to_ptr.vmem [resolvable:$true] %s142_s26 }
  0x34   : > { %s640_s27 = scalar_lea.hbm %s849_s25, %s838_s7  ;;  %s644_s30 = scalar_lea.hbm %s970_s0, 768 }
  0x35   : > { %p641_p11 = scmp.ne.s32.totalorder %s849_s25, %s640_s27  ;;  %p645_p2 = scmp.lt.s32.totalorder %s849_s25, %s970_s0 }
  0x36   : > { %p646_p0 = scmp.lt.s32.totalorder %s644_s30, %s640_s27 }
  0x37   : > { %p642_p12 = pnand %p641_p11, %p454_p5 }
  0x38   : > { %p647_p7 = por %p646_p0, %p645_p2 }
  0x39   : > { %p643_p1 = pneg %p642_p12 }
  0x3b   : > { %p648_p3 = pnand %p647_p7, %p643_p1 }
  0x3d   : > { %651 = shalt.err (!%p648_p3)
}
  0x3e   : > { %s652_s5 = scalar_lea.vmem %s851_s26, %s838_s7  ;;  %s739_s6 = smov [#allocation2]  }
  0x3f   : > { %p653_p8 = scmp.ne.s32.totalorder %s851_s26, %s652_s5  ;;  %s656_s8 = sshll.u32 %s739_s6, 4  ;;  %s657_s8 = int_to_ptr.vmem [resolvable:$false] %s656_s8 }
  0x40   : > { %s658_s16 = scalar_lea.vmem %s657_s8, 1024  ;;  %p659_p11 = scmp.lt.s32.totalorder %s851_s26, %s657_s8 }
  0x41   : > { %p654_p9 = pnand %p653_p8, %p454_p5  ;;  %p660_p12 = scmp.lt.s32.totalorder %s658_s16, %s652_s5 }
  0x43   : > { %p655_p6 = pneg %p654_p9  ;;  %p661_p10 = por %p660_p12, %p659_p11 }
  0x45   : > { %p662_p2 = pnand %p661_p10, %p655_p6 }
  0x47   : > { %665 = shalt.err (!%p662_p2)
}
  0x48   : > { %s740_s17 = smov 256   ;;  %s741_s19 = smov 16  }
  0x49   : > { %148 = dma.hbm_to_vmem [thread:$0]  (%p454_p5), %s849_s25, %s838_s7, %s851_s26, %s841_s14, %s740_s17, %s740_s17, %s741_s19  }
  0x4a PF: > { %154 = sbr.rel (%p820_p13) target bundleno = 475 (0x1db), region = 28  ;;  %s880_s24 = sand.u32 (!%p820_p13), 1, %s726_s10  }
  0x4b   : > { %s460_s27 = sshll.u32 (!%p820_p13), %s880_s24, 5  ;;  %s157_s28 = scalar_lea.sflag (!%p820_p13), [#allocation3], %s880_s24 }
  0x4c   : > { %s160_s29 = scalar_lea.vmem (!%p820_p13), [#allocation2], %s460_s27  ;;  %p980_p10 = scmp.ne.s32.totalorder (!%p820_p13), %s976_s20, 0 }
  0x4f   : > { %709 = dma.done.wait (%p980_p10), %s157_s28, 512  }
  0x50   : > { %711 = vsyncadd (%p980_p10), %s157_s28, 4294966784 }
  0x51   : > { %713 = dma.done.wait (%p40_p4), [#allocation6], 4096  }
  0x52   : > { %715 = vsyncadd (%p40_p4), [#allocation6], 4294963200  ;;  %v892_v0 = vld [vmem:[%s160_s29] sm:$0xff]  ;;  %v894_v1 = vld [vmem:[%s160_s29 + $0x8] sm:$0xff]  ;;  %s462_s20 = sshll.u32 %s880_s24, 4  ;;  %s344_s7 = scalar_lea.sflag [#allocation4], %s880_s24 }
  0x53   : > { %v896_v2 = vld [vmem:[%s160_s29 + $0x10] sm:$0xff]  ;;  %v200_v3 = vmax.f32 %v892_v0, %v894_v1  ;;  %v900_v4 = vld [vmem:[%s160_s29 + $0x18] sm:$0xff]  ;;  %v253_v10 = vld [vmem:[#allocation5 + $0xe8] sm:$0xff]  ;;  %s184_s23 = scalar_lea.vmem [#allocation7], %s462_s20  ;;  %p981_p4 = scmp.ne.s32.totalorder %s977_s21, 0 }
  0x54   : > { %v255_v5 = vld [vmem:[#allocation5 + $0xf8] sm:$0xff]  ;;  %v254_v7 = vld [vmem:[#allocation5 + $0xf0] sm:$0xff]  ;;  %v203_v9 = vmax.f32 %v896_v2, %v900_v4  ;;  %v237_v11 = vld [vmem:[#allocation5 + $0x68] sm:$0xff]  ;;  %s464_s14 = sshll.u32 (%p981_p4), %s781_s13, 1 }
  0x55   : > { %v239_v6 = vld [vmem:[#allocation5 + $0x78] sm:$0xff]  ;;  %476 = vmatprep.subr.mxu0 %v255_v5  ;;  %v238_v8 = vld [vmem:[#allocation5 + $0x70] sm:$0xff]  ;;  %514 = vmatprep.subr.mxu1 %v255_v5  ;;  %v252_v12 = vld [vmem:[#allocation5 + $0xe0] sm:$0xff]  ;;  %s352_s25 = ssub.s32 (%p981_p4), 3, %s464_s14 }
  0x56   : > { %201 = vmax.xlane.f32.xlu0 %v200_v3  ;;  %477 = vmatpush3.msra.mxu0 %v239_v6  ;;  %v236_v13 = vld [vmem:[#allocation5 + $0x60] sm:$0xff]  ;;  %v251_v14 = vld [vmem:[#allocation5 + $0xd8] sm:$0xff]  ;;  %v250_v16 = vld [vmem:[#allocation5 + $0xd0] sm:$0xff]  ;;  %p353_p13 = scmp.lt.s32.totalorder (%p981_p4), %s352_s25, 2 }
  0x57   : > { %478 = vmatprep.subr.mxu0 %v254_v7  ;;  %530 = vmatpush3.msra.mxu1 %v239_v6  ;;  %v235_v15 = vld [vmem:[#allocation5 + $0x58] sm:$0xff]  ;;  %v234_v17 = vld [vmem:[#allocation5 + $0x50] sm:$0xff]  ;;  %v249_v18 = vld [vmem:[#allocation5 + $0xc8] sm:$0xff] }
  0x58   : > { %479 = vmatpush3.msra.mxu0 %v238_v8  ;;  %515 = vmatprep.subr.mxu1 %v254_v7  ;;  %v233_v19 = vld [vmem:[#allocation5 + $0x48] sm:$0xff]  ;;  %v248_v20 = vld [vmem:[#allocation5 + $0xc0] sm:$0xff]  ;;  %v247_v22 = vld [vmem:[#allocation5 + $0xb8] sm:$0xff] }
  0x59   : > { %480 = vmatprep.subr.mxu0 %v253_v10  ;;  %531 = vmatpush3.msra.mxu1 %v238_v8  ;;  %v232_v21 = vld [vmem:[#allocation5 + $0x40] sm:$0xff]  ;;  %v231_v23 = vld [vmem:[#allocation5 + $0x38] sm:$0xff]  ;;  %v246_v24 = vld [vmem:[#allocation5 + $0xb0] sm:$0xff] }
  0x5a   : > { %204 = vmax.xlane.f32.xlu0 %v203_v9  ;;  %481 = vmatpush3.msra.mxu0 %v237_v11  ;;  %v230_v25 = vld [vmem:[#allocation5 + $0x30] sm:$0xff]  ;;  %v245_v26 = vld [vmem:[#allocation5 + $0xa8] sm:$0xff]  ;;  %v244_v28 = vld [vmem:[#allocation5 + $0xa0] sm:$0xff] }
  0x5b   : > { %482 = vmatprep.subr.mxu0 %v252_v12  ;;  %516 = vmatprep.subr.mxu1 %v253_v10  ;;  %v229_v27 = vld [vmem:[#allocation5 + $0x28] sm:$0xff]  ;;  %v228_v29 = vld [vmem:[#allocation5 + $0x20] sm:$0xff]  ;;  %v243_v30 = vld [vmem:[#allocation5 + $0x98] sm:$0xff] }
  0x5c   : > { %483 = vmatpush3.msra.mxu0 %v236_v13  ;;  %532 = vmatpush3.msra.mxu1 %v237_v11  ;;  %v227_v31 = vld [vmem:[#allocation5 + $0x18] sm:$0xff]  ;;  %v242_v32 = vld [vmem:[#allocation5 + $0x90] sm:$0xff]  ;;  %v241_v34 = vld [vmem:[#allocation5 + $0x88] sm:$0xff] }
  0x5d   : > { %484 = vmatprep.subr.mxu0 %v251_v14  ;;  %517 = vmatprep.subr.mxu1 %v252_v12  ;;  %v226_v33 = vld [vmem:[#allocation5 + $0x10] sm:$0xff]  ;;  %v225_v35 = vld [vmem:[#allocation5 + $0x8] sm:$0xff]  ;;  %v240_v36 = vld [vmem:[#allocation5 + $0x80] sm:$0xff] }
  0x5e   : > { %485 = vmatpush3.msra.mxu0 %v235_v15  ;;  %533 = vmatpush3.msra.mxu1 %v236_v13  ;;  %v224_v37 = vld [vmem:[#allocation5] sm:$0xff] }
  0x5f   : > { %486 = vmatprep.subr.mxu0 %v250_v16  ;;  %518 = vmatprep.subr.mxu1 %v251_v14 }
  0x60   : > { %487 = vmatpush3.msra.mxu0 %v234_v17  ;;  %534 = vmatpush3.msra.mxu1 %v235_v15 }
  0x61   : > { %488 = vmatprep.subr.mxu0 %v249_v18  ;;  %519 = vmatprep.subr.mxu1 %v250_v16 }
  0x62   : > { %489 = vmatpush3.msra.mxu0 %v233_v19  ;;  %535 = vmatpush3.msra.mxu1 %v234_v17 }
  0x63   : > { %490 = vmatprep.subr.mxu0 %v248_v20  ;;  %520 = vmatprep.subr.mxu1 %v249_v18 }
  0x64   : > { %491 = vmatpush3.msra.mxu0 %v232_v21  ;;  %536 = vmatpush3.msra.mxu1 %v233_v19 }
  0x65   : > { %492 = vmatprep.subr.mxu0 %v247_v22  ;;  %521 = vmatprep.subr.mxu1 %v248_v20 }
  0x66   : > { %493 = vmatpush3.msra.mxu0 %v231_v23  ;;  %537 = vmatpush3.msra.mxu1 %v232_v21 }
  0x67   : > { %494 = vmatprep.subr.mxu0 %v246_v24  ;;  %522 = vmatprep.subr.mxu1 %v247_v22 }
  0x68   : > { %495 = vmatpush3.msra.mxu0 %v230_v25  ;;  %538 = vmatpush3.msra.mxu1 %v231_v23 }
  0x69   : > { %496 = vmatprep.subr.mxu0 %v245_v26  ;;  %523 = vmatprep.subr.mxu1 %v246_v24 }
  0x6a   : > { %497 = vmatpush3.msra.mxu0 %v229_v27  ;;  %539 = vmatpush3.msra.mxu1 %v230_v25 }
  0x6b   : > { %498 = vmatprep.subr.mxu0 %v244_v28  ;;  %524 = vmatprep.subr.mxu1 %v245_v26 }
  0x6c   : > { %499 = vmatpush3.msra.mxu0 %v228_v29  ;;  %540 = vmatpush3.msra.mxu1 %v229_v27 }
  0x6d   : > { %500 = vmatprep.subr.mxu0 %v243_v30  ;;  %525 = vmatprep.subr.mxu1 %v244_v28 }
  0x6e   : > { %501 = vmatpush3.msra.mxu0 %v227_v31  ;;  %541 = vmatpush3.msra.mxu1 %v228_v29 }
  0x6f   : > { %502 = vmatprep.subr.mxu0 %v242_v32  ;;  %526 = vmatprep.subr.mxu1 %v243_v30 }
  0x70   : > { %503 = vmatpush3.msra.mxu0 %v226_v33  ;;  %542 = vmatpush3.msra.mxu1 %v227_v31 }
  0x71   : > { %504 = vmatprep.subr.mxu0 %v241_v34  ;;  %527 = vmatprep.subr.mxu1 %v242_v32 }
  0x72   : > { %505 = vmatpush3.msra.mxu0 %v225_v35  ;;  %543 = vmatpush3.msra.mxu1 %v226_v33 }
  0x73   : > { %506 = vmatprep.subr.mxu0 %v240_v36  ;;  %528 = vmatprep.subr.mxu1 %v241_v34 }
  0x74   : > { %507 = vmatpush3.msra.mxu0 %v224_v37  ;;  %544 = vmatpush3.msra.mxu1 %v225_v35 }
  0x75   : > { %529 = vmatprep.subr.mxu1 %v240_v36 }
  0x76   : > { %545 = vmatpush3.msra.mxu1 %v224_v37 }
  0xdf   : > { %v202_v38 = vpop.xlane.xlu0 %201 }
  0xe0   : > { %v206_v39 = vsub.f32 %v892_v0, %v202_v38  ;;  %v207_v40 = vsub.f32 %v894_v1, %v202_v38 }
  0xe2   : > { %v210_v41 = vmul.f32 1.442695, %v206_v39  ;;  %v212_v42 = vmul.f32 1.442695, %v207_v40 }
  0xe3   : > { %v205_v43 = vpop.xlane.xlu0 %204 }
  0xe4   : > { %602 = vpow2.f32 %v210_v41  ;;  %v208_v44 = vsub.f32 %v896_v2, %v205_v43  ;;  %v209_v45 = vsub.f32 %v900_v4, %v205_v43 }
  0xe5   : > { %604 = vpow2.f32 %v212_v42 }
  0xe6   : > { %v214_v46 = vmul.f32 1.442695, %v208_v44  ;;  %v216_v47 = vmul.f32 1.442695, %v209_v45 }
  0xe8   : > { %606 = vpow2.f32 %v214_v46 }
  0xe9   : > { %608 = vpow2.f32 %v216_v47 }
  0xf1   : > { %v603_v48 = vpop.eup %602 }
  0xf2   : > { %v605_v49 = vpop.eup %604 }
  0xf3   : > { %320 = vmatprep.mubr.f32.mxu0 %v605_v49  ;;  %v218_v50 = vadd.f32 %v605_v49, %v603_v48 }
  0xf4   : > { %321 = vmatmul.mubr.f32.vlgmr.msra.gmra.mxu0 %v603_v48 }
  0xf5   : > { %v607_v51 = vpop.eup %606  ;;  %219 = vadd.xlane.f32.xlu1 %v218_v50 }
  0xf6   : > { %v609_v52 = vpop.eup %608 }
  0xf7   : > { %325 = vmatprep.mubr.f32.mxu1 %v609_v52  ;;  %v221_v53 = vadd.f32 %v609_v52, %v607_v51 }
  0xf8   : > { %326 = vmatmul.mubr.f32.vlgmr.msra.gmra.mxu1 %v607_v51 }
  0xf9   : > { %222 = vadd.xlane.f32.xlu1 %v221_v53 }
 0x17e   : > { %v220_v54 = vpop.xlane.xlu1 %219 }
 0x17f   : > { %610 = vrcp.f32 %v220_v54 }
 0x182   : > { %v223_v55 = vpop.xlane.xlu1 %222 }
 0x183   : > { %612 = vrcp.f32 %v223_v55 }
 0x18c   : > { %v611_v56 = vpop.eup %610 }
 0x18d   : > { %v333_v57 = vmul.f32 %v611_v56, %v220_v54 }
 0x18f   : > { %v335_v59 = vsub.f32 2.0, %v333_v57 }
 0x190   : > { %v613_v58 = vpop.eup %612 }
 0x191   : > { %v334_v60 = vmul.f32 %v613_v58, %v223_v55  ;;  %v337_v63 = vmul.f32 %v611_v56, %v335_v59 }
 0x193   : > { %v336_v0 = vsub.f32 2.0, %v334_v60 }
 0x195   : > { %v338_v5 = vmul.f32 %v613_v58, %v336_v0 }
 0x1b4   : > { %v508_v61 = vpop.f32.mrf.mxu0 }
 0x1b6   : > { %v509_v62 = vpop.f32.mrf.mxu0 }
 0x1b7   : > { %v510_v1 = vadd.f32 %v509_v62, %v508_v61 }
 0x1b8   : > { %v511_v2 = vpop.f32.mrf.mxu1 }
 0x1b9   : > { %v339_v3 = vmul.f32 %v510_v1, %v337_v63 }
 0x1ba   : > { %v512_v4 = vpop.f32.mrf.mxu1 }
 0x1bb   : > { %341 = vst [vmem:[%s184_s23] sm:$0xff] %v339_v3  ;;  %v513_v6 = vadd.f32 %v512_v4, %v511_v2  ;;  %350 = sbr.rel (!%p981_p4) target bundleno = 475 (0x1db), region = 40 }
 0x1bd   : > { %v340_v7 = vmul.f32 %v513_v6, %v338_v5 }
 0x1bf   : > { %342 = vst [vmem:[%s184_s23 + $0x8] sm:$0xff] %v340_v7 }
 0x1c0   : > { %s991_s25 = smov (!%p353_p13, %s352_s25), 2 }
 0x1c1   : > { %s913_s26 = sshll.u32 %s991_s25, 7 }
 0x1c2   : > { %s357_s30 = ssub.s32 256, %s913_s26 }
 0x1c3   : > { %358 = vsyncadd %s344_s7, %s357_s30  ;;  %p466_p5 = scmp.ne.s32.totalorder %s913_s26, 0  ;;  %s475_s3 = sshll.u32 %s781_s13, 8 }
 0x1c4   : > { %s923_s5 = scalar_lea.hbm %s972_s2, %s475_s3  ;;  %s363_s6 = sshll.u32 %s184_s23, 4  ;;  %s925_s6 = int_to_ptr.vmem [resolvable:$true] %s363_s6 }
 0x1c5   : > { %s666_s8 = scalar_lea.vmem %s925_s6, %s913_s26  ;;  %s742_s16 = smov [#allocation7]  }
 0x1c6   : > { %p667_p1 = scmp.ne.s32.totalorder %s925_s6, %s666_s8  ;;  %s670_s17 = sshll.u32 %s742_s16, 4  ;;  %s671_s17 = int_to_ptr.vmem [resolvable:$false] %s670_s17 }
 0x1c7   : > { %s672_s13 = scalar_lea.vmem %s671_s17, 512  ;;  %p673_p3 = scmp.lt.s32.totalorder %s925_s6, %s671_s17 }
 0x1c8   : > { %p668_p0 = pnand %p667_p1, %p466_p5  ;;  %p674_p8 = scmp.lt.s32.totalorder %s672_s13, %s666_s8 }
 0x1ca   : > { %p669_p7 = pneg %p668_p0  ;;  %p675_p9 = por %p674_p8, %p673_p3 }
 0x1cc   : > { %p676_p6 = pnand %p675_p9, %p669_p7 }
 0x1ce   : > { %679 = shalt.err (!%p676_p6)
}
 0x1cf   : > { %s680_s19 = scalar_lea.hbm %s923_s5, %s913_s26  ;;  %s684_s29 = scalar_lea.hbm %s972_s2, 384 }
 0x1d0   : > { %p681_p11 = scmp.ne.s32.totalorder %s923_s5, %s680_s19  ;;  %p685_p10 = scmp.lt.s32.totalorder %s923_s5, %s972_s2 }
 0x1d1   : > { %p686_p4 = scmp.lt.s32.totalorder %s684_s29, %s680_s19 }
 0x1d2   : > { %p682_p12 = pnand %p681_p11, %p466_p5 }
 0x1d3   : > { %p687_p13 = por %p686_p4, %p685_p10 }
 0x1d4   : > { %p683_p2 = pneg %p682_p12 }
 0x1d6   : > { %p688_p1 = pnand %p687_p13, %p683_p2 }
 0x1d8   : > { %691 = shalt.err (!%p688_p1)
}
 0x1d9   : > { %s743_s14 = smov 128   ;;  %s744_s25 = smov 8  }
 0x1da   : > { %369 = dma.vmem_to_hbm [thread:$0]  (%p466_p5), %s925_s6, %s913_s26, %s923_s5, %s344_s7, %s743_s14, %s743_s14, %s744_s25  }
 0x1db PF: > { %s378_s30 = sand.u32 1, %s722_s9   ;;  %p982_p0 = scmp.ne.s32.totalorder %s978_s22, 0 }
 0x1dc   : > { %p983_p7 = scmp.ge.s32.totalorder %s734_s12, 2  ;;  %s379_s3 = scalar_lea.sflag [#allocation4], %s378_s30 }
 0x1de   : > { %p557_p3 = pnand %p983_p7, %p982_p0 }
 0x1e0   : > { %p558_p8 = pneg %p557_p3 }
 0x1e2   : > { %717 = dma.done.wait (%p558_p8), %s379_s3, 256  }
 0x1e3   : > { %719 = vsyncadd (%p558_p8), %s379_s3, 4294967040  ;;  %p16_p9 = scmp.ge.s32.totalorder %s785_s15, 4   ;;  %s984_s9 = smov %s726_s10 }
 0x1e4   : > { %s985_s10 = smov %s730_s11  ;;  %s986_s11 = smov %s797_s18 }
 0x1e5   : > { %s987_s12 = smov %s785_s15  ;;  %18 = sbr.rel (!%p16_p9) target bundleno = 6 (0x6), region = 77 }
 0x1ea   :  { %384 = vsyncpa [#allocation3], 1 }
 0x1eb   :  { %386 = vsyncpa [#allocation3 + $0x1], 1 }
 0x1ec   :  { %387 = vsyncpa [#allocation6], 1 }
 0x1ed   :  { %388 = vsyncpa [#allocation4], 1 }
 0x1ee   :  { %390 = vsyncpa [#allocation4 + $0x1], 1 }

// kernel: tpu_custom_call.1
= control target key start
LH: loop header
LB: loop body
LE: loop exit
PB: predicated region body
PF: predicated region fallthrough
CT: control target
= control target key end

     0   :  { %7 = vsyncpa [#allocation3], 0  ;;  %s970_s0 = inlined_call_operand.hbm [shape: f32[20,256], index: 0, kind: input, shape index: {}]   ;;  %s971_s1 = inlined_call_operand.hbm [shape: f32[256,128], index: 1, kind: input, shape index: {}]   ;;  %s972_s2 = inlined_call_operand.hbm [shape: f32[20,128], index: 2, kind: output, shape index: {}]  }
   0x1   :  { %9 = vsyncpa [#allocation3 + $0x1], 0 }
   0x2   :  { %10 = vsyncpa [#allocation6], 0 }
   0x3   :  { %11 = vsyncpa [#allocation4], 0 }
   0x4   :  { %13 = vsyncpa [#allocation4 + $0x1], 0  ;;  %s760_s9 = smov 0   ;;  %s762_s10 = smov 0  }
   0x5   :  { %s764_s11 = smov 0   ;;  %s766_s12 = smov 0  }
   0x6 LB: > { %s781_s13 = sadd.s32 4294967295, %s734_s12   ;;  %s446_s14 = sadd.s32 4294967294, %s734_s12   ;;  %s734_s12 = sphi %s766_s12, %s987_s12   ;;  %s730_s11 = sphi %s764_s11, %s986_s11   ;;  %s726_s10 = sphi %s762_s10, %s985_s10   ;;  %s722_s9 = sphi %s760_s9, %s984_s9  }
   0x7   : > { %s785_s15 = sadd.s32 1, %s734_s12   ;;  %s26_s16 = sadd.s32 1, %s730_s11 }
   0x8   : > { %s23_s17 = ssub.s32 %s734_s12, %s785_s15  ;;  %p33_p0 = scmp.ne.s32.totalorder %s730_s11, %s726_s10 }
   0x9   : > { %p24_p1 = scmp.eq.s32.totalorder %s23_s17, 0  ;;  %p34_p2 = scmp.eq.s32.totalorder %s734_s12, 0 }
   0xa   : > { %p39_p3 = scmp.ne.s32.totalorder %s726_s10, %s722_s9  ;;  %p40_p4 = scmp.eq.s32.totalorder %s781_s13, 0 }
   0xb   : > { %s797_s18 = scalar_select %p24_p1, %s730_s11, %s26_s16  }
   0xc   : > { %p799_p5 = por %p34_p2, %p33_p0  ;;  %p805_p6 = por %p40_p4, %p39_p3 }
   0xd   : > { %p84_p7 = scmp.eq.s32.totalorder %s781_s13, 1  ;;  %p90_p8 = scmp.eq.s32.totalorder %s446_s14, 1 }
   0xe   : > { %s976_s20 = scalar_select %p805_p6, 1, 0 }
   0xf   : > { %p447_p9 = scmp.ge.s32.totalorder %s734_s12, 1  ;;  %p97_p10 = scmp.lt.s32.totalorder %s734_s12, 3 }
  0x10   : > { %p812_p11 = por %p84_p7, %p33_p0  ;;  %p816_p12 = por %p90_p8, %p39_p3 }
  0x11   : > { %p820_p13 = pnand %p447_p9, %p97_p10  ;;  %s736_s24 = smov [#allocation5]  }
  0x12   : > { %s977_s21 = scalar_select %p812_p11, 1, 0 }
  0x13   : > { %s978_s22 = scalar_select %p816_p12, 1, 0 }
  0x14   : > { %p552_p1 = pneg %p820_p13  ;;  %s109_s25 = sshll.u32 %s736_s24, 4  ;;  %s110_s25 = int_to_ptr.vmem [resolvable:$true] %s109_s25 }
  0x15   : > { %s625_s26 = scalar_lea.vmem %s110_s25, 4096  ;;  %p633_p8 = scmp.lt.s32.totalorder %s110_s25, %s110_s25 }
  0x16   : > { %p553_p2 = pnand %p552_p1, %p40_p4  ;;  %p626_p7 = scmp.ne.s32.totalorder %s110_s25, %s625_s26 }
  0x17   : > { %p634_p6 = scmp.lt.s32.totalorder %s625_s26, %s625_s26 }
  0x18   : > { %p616_p0 = pneg %p553_p2 }
  0x19   : > { %p635_p12 = por %p634_p6, %p633_p8 }
  0x1a   : > { %p628_p11 = pnand %p626_p7, %p616_p0 }
  0x1c   : > { %p629_p3 = pneg %p628_p11 }
  0x1e   : > { %p636_p9 = pnand %p635_p12, %p629_p3 }
  0x20   : > { %639 = shalt.err (!%p636_p9)
}
  0x21   : > { %s737_s27 = smov 128   ;;  %s738_s28 = smov 8  }
  0x22   : > { %555 = dma.hbm_to_vmem [thread:$0]  (!%p553_p2), %s971_s1, 4096, %s110_s25, [#allocation6], %s737_s27, %s737_s27, %s738_s28  }
  0x23   : > { %p974_p10 = scmp.ge.s32.totalorder %s734_s12, 2 }
  0x25   : > { %119 = sbr.rel (%p974_p10) target bundleno = 74 (0x4a), region = 20 }
  0x2a   : > { %122 = sbr.rel (!%p799_p5) target bundleno = 74 (0x4a), region = 24  ;;  %s123_s3 = sand.u32 (%p799_p5), 1, %s730_s11  }
  0x2b   : > { %s451_s4 = sshll.u32 (%p799_p5), %s734_s12, 1  ;;  %s450_s5 = sshll.u32 (%p799_p5), %s123_s3, 5 }
  0x2c   : > { %s129_s6 = ssub.s32 (%p799_p5), 3, %s451_s4  ;;  %s841_s14 = scalar_lea.sflag (%p799_p5), [#allocation3], %s123_s3 }
  0x2d   : > { %p130_p6 = scmp.lt.s32.totalorder (%p799_p5), %s129_s6, 2  ;;  %s127_s16 = scalar_lea.vmem (%p799_p5), [#allocation2], %s450_s5 }
  0x2f   : > { %s989_s6 = smov (!%p130_p6, %s129_s6), 2 }
  0x30   : > { %s838_s7 = sshll.u32 %s989_s6, 8 }
  0x31   : > { %s135_s8 = ssub.s32 512, %s838_s7 }
  0x32   : > { %136 = vsyncadd %s841_s14, %s135_s8  ;;  %p454_p5 = scmp.ne.s32.totalorder %s838_s7, 0  ;;  %s474_s17 = sshll.u32 %s734_s12, 9 }
  0x33   : > { %s849_s25 = scalar_lea.hbm %s970_s0, %s474_s17  ;;  %s142_s26 = sshll.u32 %s127_s16, 4  ;;  %s851_s26 = int_to_ptr.vmem [resolvable:$true] %s142_s26 }
  0x34   : > { %s640_s27 = scalar_lea.hbm %s849_s25, %s838_s7  ;;  %s644_s30 = scalar_lea.hbm %s970_s0, 768 }
  0x35   : > { %p641_p11 = scmp.ne.s32.totalorder %s849_s25, %s640_s27  ;;  %p645_p2 = scmp.lt.s32.totalorder %s849_s25, %s970_s0 }
  0x36   : > { %p646_p0 = scmp.lt.s32.totalorder %s644_s30, %s640_s27 }
  0x37   : > { %p642_p12 = pnand %p641_p11, %p454_p5 }
  0x38   : > { %p647_p7 = por %p646_p0, %p645_p2 }
  0x39   : > { %p643_p1 = pneg %p642_p12 }
  0x3b   : > { %p648_p3 = pnand %p647_p7, %p643_p1 }
  0x3d   : > { %651 = shalt.err (!%p648_p3)
}
  0x3e   : > { %s652_s5 = scalar_lea.vmem %s851_s26, %s838_s7  ;;  %s739_s6 = smov [#allocation2]  }
  0x3f   : > { %p653_p8 = scmp.ne.s32.totalorder %s851_s26, %s652_s5  ;;  %s656_s8 = sshll.u32 %s739_s6, 4  ;;  %s657_s8 = int_to_ptr.vmem [resolvable:$false] %s656_s8 }
  0x40   : > { %s658_s16 = scalar_lea.vmem %s657_s8, 1024  ;;  %p659_p11 = scmp.lt.s32.totalorder %s851_s26, %s657_s8 }
  0x41   : > { %p654_p9 = pnand %p653_p8, %p454_p5  ;;  %p660_p12 = scmp.lt.s32.totalorder %s658_s16, %s652_s5 }
  0x43   : > { %p655_p6 = pneg %p654_p9  ;;  %p661_p10 = por %p660_p12, %p659_p11 }
  0x45   : > { %p662_p2 = pnand %p661_p10, %p655_p6 }
  0x47   : > { %665 = shalt.err (!%p662_p2)
}
  0x48   : > { %s740_s17 = smov 256   ;;  %s741_s19 = smov 16  }
  0x49   : > { %148 = dma.hbm_to_vmem [thread:$0]  (%p454_p5), %s849_s25, %s838_s7, %s851_s26, %s841_s14, %s740_s17, %s740_s17, %s741_s19  }
  0x4a PF: > { %154 = sbr.rel (%p820_p13) target bundleno = 475 (0x1db), region = 28  ;;  %s880_s24 = sand.u32 (!%p820_p13), 1, %s726_s10  }
  0x4b   : > { %s460_s27 = sshll.u32 (!%p820_p13), %s880_s24, 5  ;;  %s157_s28 = scalar_lea.sflag (!%p820_p13), [#allocation3], %s880_s24 }
  0x4c   : > { %s160_s29 = scalar_lea.vmem (!%p820_p13), [#allocation2], %s460_s27  ;;  %p980_p10 = scmp.ne.s32.totalorder (!%p820_p13), %s976_s20, 0 }
  0x4f   : > { %709 = dma.done.wait (%p980_p10), %s157_s28, 512  }
  0x50   : > { %711 = vsyncadd (%p980_p10), %s157_s28, 4294966784 }
  0x51   : > { %713 = dma.done.wait (%p40_p4), [#allocation6], 4096  }
  0x52   : > { %715 = vsyncadd (%p40_p4), [#allocation6], 4294963200  ;;  %v892_v0 = vld [vmem:[%s160_s29] sm:$0xff]  ;;  %v894_v1 = vld [vmem:[%s160_s29 + $0x8] sm:$0xff]  ;;  %s462_s20 = sshll.u32 %s880_s24, 4  ;;  %s344_s7 = scalar_lea.sflag [#allocation4], %s880_s24 }
  0x53   : > { %v896_v2 = vld [vmem:[%s160_s29 + $0x10] sm:$0xff]  ;;  %v200_v3 = vmax.f32 %v892_v0, %v894_v1  ;;  %v900_v4 = vld [vmem:[%s160_s29 + $0x18] sm:$0xff]  ;;  %v253_v10 = vld [vmem:[#allocation5 + $0xe8] sm:$0xff]  ;;  %s184_s23 = scalar_lea.vmem [#allocation7], %s462_s20  ;;  %p981_p4 = scmp.ne.s32.totalorder %s977_s21, 0 }
  0x54   : > { %v255_v5 = vld [vmem:[#allocation5 + $0xf8] sm:$0xff]  ;;  %v254_v7 = vld [vmem:[#allocation5 + $0xf0] sm:$0xff]  ;;  %v203_v9 = vmax.f32 %v896_v2, %v900_v4  ;;  %v237_v11 = vld [vmem:[#allocation5 + $0x68] sm:$0xff]  ;;  %s464_s14 = sshll.u32 (%p981_p4), %s781_s13, 1 }
  0x55   : > { %v239_v6 = vld [vmem:[#allocation5 + $0x78] sm:$0xff]  ;;  %476 = vmatprep.subr.mxu0 %v255_v5  ;;  %v238_v8 = vld [vmem:[#allocation5 + $0x70] sm:$0xff]  ;;  %514 = vmatprep.subr.mxu1 %v255_v5  ;;  %v252_v12 = vld [vmem:[#allocation5 + $0xe0] sm:$0xff]  ;;  %s352_s25 = ssub.s32 (%p981_p4), 3, %s464_s14 }
  0x56   : > { %201 = vmax.xlane.f32.xlu0 %v200_v3  ;;  %477 = vmatpush3.msra.mxu0 %v239_v6  ;;  %v236_v13 = vld [vmem:[#allocation5 + $0x60] sm:$0xff]  ;;  %v251_v14 = vld [vmem:[#allocation5 + $0xd8] sm:$0xff]  ;;  %v250_v16 = vld [vmem:[#allocation5 + $0xd0] sm:$0xff]  ;;  %p353_p13 = scmp.lt.s32.totalorder (%p981_p4), %s352_s25, 2 }
  0x57   : > { %478 = vmatprep.subr.mxu0 %v254_v7  ;;  %530 = vmatpush3.msra.mxu1 %v239_v6  ;;  %v235_v15 = vld [vmem:[#allocation5 + $0x58] sm:$0xff]  ;;  %v234_v17 = vld [vmem:[#allocation5 + $0x50] sm:$0xff]  ;;  %v249_v18 = vld [vmem:[#allocation5 + $0xc8] sm:$0xff] }
  0x58   : > { %479 = vmatpush3.msra.mxu0 %v238_v8  ;;  %515 = vmatprep.subr.mxu1 %v254_v7  ;;  %v233_v19 = vld [vmem:[#allocation5 + $0x48] sm:$0xff]  ;;  %v248_v20 = vld [vmem:[#allocation5 + $0xc0] sm:$0xff]  ;;  %v247_v22 = vld [vmem:[#allocation5 + $0xb8] sm:$0xff] }
  0x59   : > { %480 = vmatprep.subr.mxu0 %v253_v10  ;;  %531 = vmatpush3.msra.mxu1 %v238_v8  ;;  %v232_v21 = vld [vmem:[#allocation5 + $0x40] sm:$0xff]  ;;  %v231_v23 = vld [vmem:[#allocation5 + $0x38] sm:$0xff]  ;;  %v246_v24 = vld [vmem:[#allocation5 + $0xb0] sm:$0xff] }
  0x5a   : > { %204 = vmax.xlane.f32.xlu0 %v203_v9  ;;  %481 = vmatpush3.msra.mxu0 %v237_v11  ;;  %v230_v25 = vld [vmem:[#allocation5 + $0x30] sm:$0xff]  ;;  %v245_v26 = vld [vmem:[#allocation5 + $0xa8] sm:$0xff]  ;;  %v244_v28 = vld [vmem:[#allocation5 + $0xa0] sm:$0xff] }
  0x5b   : > { %482 = vmatprep.subr.mxu0 %v252_v12  ;;  %516 = vmatprep.subr.mxu1 %v253_v10  ;;  %v229_v27 = vld [vmem:[#allocation5 + $0x28] sm:$0xff]  ;;  %v228_v29 = vld [vmem:[#allocation5 + $0x20] sm:$0xff]  ;;  %v243_v30 = vld [vmem:[#allocation5 + $0x98] sm:$0xff] }
  0x5c   : > { %483 = vmatpush3.msra.mxu0 %v236_v13  ;;  %532 = vmatpush3.msra.mxu1 %v237_v11  ;;  %v227_v31 = vld [vmem:[#allocation5 + $0x18] sm:$0xff]  ;;  %v242_v32 = vld [vmem:[#allocation5 + $0x90] sm:$0xff]  ;;  %v241_v34 = vld [vmem:[#allocation5 + $0x88] sm:$0xff] }
  0x5d   : > { %484 = vmatprep.subr.mxu0 %v251_v14  ;;  %517 = vmatprep.subr.mxu1 %v252_v12  ;;  %v226_v33 = vld [vmem:[#allocation5 + $0x10] sm:$0xff]  ;;  %v225_v35 = vld [vmem:[#allocation5 + $0x8] sm:$0xff]  ;;  %v240_v36 = vld [vmem:[#allocation5 + $0x80] sm:$0xff] }
  0x5e   : > { %485 = vmatpush3.msra.mxu0 %v235_v15  ;;  %533 = vmatpush3.msra.mxu1 %v236_v13  ;;  %v224_v37 = vld [vmem:[#allocation5] sm:$0xff] }
  0x5f   : > { %486 = vmatprep.subr.mxu0 %v250_v16  ;;  %518 = vmatprep.subr.mxu1 %v251_v14 }
  0x60   : > { %487 = vmatpush3.msra.mxu0 %v234_v17  ;;  %534 = vmatpush3.msra.mxu1 %v235_v15 }
  0x61   : > { %488 = vmatprep.subr.mxu0 %v249_v18  ;;  %519 = vmatprep.subr.mxu1 %v250_v16 }
  0x62   : > { %489 = vmatpush3.msra.mxu0 %v233_v19  ;;  %535 = vmatpush3.msra.mxu1 %v234_v17 }
  0x63   : > { %490 = vmatprep.subr.mxu0 %v248_v20  ;;  %520 = vmatprep.subr.mxu1 %v249_v18 }
  0x64   : > { %491 = vmatpush3.msra.mxu0 %v232_v21  ;;  %536 = vmatpush3.msra.mxu1 %v233_v19 }
  0x65   : > { %492 = vmatprep.subr.mxu0 %v247_v22  ;;  %521 = vmatprep.subr.mxu1 %v248_v20 }
  0x66   : > { %493 = vmatpush3.msra.mxu0 %v231_v23  ;;  %537 = vmatpush3.msra.mxu1 %v232_v21 }
  0x67   : > { %494 = vmatprep.subr.mxu0 %v246_v24  ;;  %522 = vmatprep.subr.mxu1 %v247_v22 }
  0x68   : > { %495 = vmatpush3.msra.mxu0 %v230_v25  ;;  %538 = vmatpush3.msra.mxu1 %v231_v23 }
  0x69   : > { %496 = vmatprep.subr.mxu0 %v245_v26  ;;  %523 = vmatprep.subr.mxu1 %v246_v24 }
  0x6a   : > { %497 = vmatpush3.msra.mxu0 %v229_v27  ;;  %539 = vmatpush3.msra.mxu1 %v230_v25 }
  0x6b   : > { %498 = vmatprep.subr.mxu0 %v244_v28  ;;  %524 = vmatprep.subr.mxu1 %v245_v26 }
  0x6c   : > { %499 = vmatpush3.msra.mxu0 %v228_v29  ;;  %540 = vmatpush3.msra.mxu1 %v229_v27 }
  0x6d   : > { %500 = vmatprep.subr.mxu0 %v243_v30  ;;  %525 = vmatprep.subr.mxu1 %v244_v28 }
  0x6e   : > { %501 = vmatpush3.msra.mxu0 %v227_v31  ;;  %541 = vmatpush3.msra.mxu1 %v228_v29 }
  0x6f   : > { %502 = vmatprep.subr.mxu0 %v242_v32  ;;  %526 = vmatprep.subr.mxu1 %v243_v30 }
  0x70   : > { %503 = vmatpush3.msra.mxu0 %v226_v33  ;;  %542 = vmatpush3.msra.mxu1 %v227_v31 }
  0x71   : > { %504 = vmatprep.subr.mxu0 %v241_v34  ;;  %527 = vmatprep.subr.mxu1 %v242_v32 }
  0x72   : > { %505 = vmatpush3.msra.mxu0 %v225_v35  ;;  %543 = vmatpush3.msra.mxu1 %v226_v33 }
  0x73   : > { %506 = vmatprep.subr.mxu0 %v240_v36  ;;  %528 = vmatprep.subr.mxu1 %v241_v34 }
  0x74   : > { %507 = vmatpush3.msra.mxu0 %v224_v37  ;;  %544 = vmatpush3.msra.mxu1 %v225_v35 }
  0x75   : > { %529 = vmatprep.subr.mxu1 %v240_v36 }
  0x76   : > { %545 = vmatpush3.msra.mxu1 %v224_v37 }
  0xdf   : > { %v202_v38 = vpop.xlane.xlu0 %201 }
  0xe0   : > { %v206_v39 = vsub.f32 %v892_v0, %v202_v38  ;;  %v207_v40 = vsub.f32 %v894_v1, %v202_v38 }
  0xe2   : > { %v210_v41 = vmul.f32 1.442695, %v206_v39  ;;  %v212_v42 = vmul.f32 1.442695, %v207_v40 }
  0xe3   : > { %v205_v43 = vpop.xlane.xlu0 %204 }
  0xe4   : > { %602 = vpow2.f32 %v210_v41  ;;  %v208_v44 = vsub.f32 %v896_v2, %v205_v43  ;;  %v209_v45 = vsub.f32 %v900_v4, %v205_v43 }
  0xe5   : > { %604 = vpow2.f32 %v212_v42 }
  0xe6   : > { %v214_v46 = vmul.f32 1.442695, %v208_v44  ;;  %v216_v47 = vmul.f32 1.442695, %v209_v45 }
  0xe8   : > { %606 = vpow2.f32 %v214_v46 }
  0xe9   : > { %608 = vpow2.f32 %v216_v47 }
  0xf1   : > { %v603_v48 = vpop.eup %602 }
  0xf2   : > { %v605_v49 = vpop.eup %604 }
  0xf3   : > { %320 = vmatprep.mubr.f32.mxu0 %v605_v49  ;;  %v218_v50 = vadd.f32 %v605_v49, %v603_v48 }
  0xf4   : > { %321 = vmatmul.mubr.f32.vlgmr.msra.gmra.mxu0 %v603_v48 }
  0xf5   : > { %v607_v51 = vpop.eup %606  ;;  %219 = vadd.xlane.f32.xlu1 %v218_v50 }
  0xf6   : > { %v609_v52 = vpop.eup %608 }
  0xf7   : > { %325 = vmatprep.mubr.f32.mxu1 %v609_v52  ;;  %v221_v53 = vadd.f32 %v609_v52, %v607_v51 }
  0xf8   : > { %326 = vmatmul.mubr.f32.vlgmr.msra.gmra.mxu1 %v607_v51 }
  0xf9   : > { %222 = vadd.xlane.f32.xlu1 %v221_v53 }
 0x17e   : > { %v220_v54 = vpop.xlane.xlu1 %219 }
 0x17f   : > { %610 = vrcp.f32 %v220_v54 }
 0x182   : > { %v223_v55 = vpop.xlane.xlu1 %222 }
 0x183   : > { %612 = vrcp.f32 %v223_v55 }
 0x18c   : > { %v611_v56 = vpop.eup %610 }
 0x18d   : > { %v333_v57 = vmul.f32 %v611_v56, %v220_v54 }
 0x18f   : > { %v335_v59 = vsub.f32 2.0, %v333_v57 }
 0x190   : > { %v613_v58 = vpop.eup %612 }
 0x191   : > { %v334_v60 = vmul.f32 %v613_v58, %v223_v55  ;;  %v337_v63 = vmul.f32 %v611_v56, %v335_v59 }
 0x193   : > { %v336_v0 = vsub.f32 2.0, %v334_v60 }
 0x195   : > { %v338_v5 = vmul.f32 %v613_v58, %v336_v0 }
 0x1b4   : > { %v508_v61 = vpop.f32.mrf.mxu0 }
 0x1b6   : > { %v509_v62 = vpop.f32.mrf.mxu0 }
 0x1b7   : > { %v510_v1 = vadd.f32 %v509_v62, %v508_v61 }
 0x1b8   : > { %v511_v2 = vpop.f32.mrf.mxu1 }
 0x1b9   : > { %v339_v3 = vmul.f32 %v510_v1, %v337_v63 }
 0x1ba   : > { %v512_v4 = vpop.f32.mrf.mxu1 }
 0x1bb   : > { %341 = vst [vmem:[%s184_s23] sm:$0xff] %v339_v3  ;;  %v513_v6 = vadd.f32 %v512_v4, %v511_v2  ;;  %350 = sbr.rel (!%p981_p4) target bundleno = 475 (0x1db), region = 40 }
 0x1bd   : > { %v340_v7 = vmul.f32 %v513_v6, %v338_v5 }
 0x1bf   : > { %342 = vst [vmem:[%s184_s23 + $0x8] sm:$0xff] %v340_v7 }
 0x1c0   : > { %s991_s25 = smov (!%p353_p13, %s352_s25), 2 }
 0x1c1   : > { %s913_s26 = sshll.u32 %s991_s25, 7 }
 0x1c2   : > { %s357_s30 = ssub.s32 256, %s913_s26 }
 0x1c3   : > { %358 = vsyncadd %s344_s7, %s357_s30  ;;  %p466_p5 = scmp.ne.s32.totalorder %s913_s26, 0  ;;  %s475_s3 = sshll.u32 %s781_s13, 8 }
 0x1c4   : > { %s923_s5 = scalar_lea.hbm %s972_s2, %s475_s3  ;;  %s363_s6 = sshll.u32 %s184_s23, 4  ;;  %s925_s6 = int_to_ptr.vmem [resolvable:$true] %s363_s6 }
 0x1c5   : > { %s666_s8 = scalar_lea.vmem %s925_s6, %s913_s26  ;;  %s742_s16 = smov [#allocation7]  }
 0x1c6   : > { %p667_p1 = scmp.ne.s32.totalorder %s925_s6, %s666_s8  ;;  %s670_s17 = sshll.u32 %s742_s16, 4  ;;  %s671_s17 = int_to_ptr.vmem [resolvable:$false] %s670_s17 }
 0x1c7   : > { %s672_s13 = scalar_lea.vmem %s671_s17, 512  ;;  %p673_p3 = scmp.lt.s32.totalorder %s925_s6, %s671_s17 }
 0x1c8   : > { %p668_p0 = pnand %p667_p1, %p466_p5  ;;  %p674_p8 = scmp.lt.s32.totalorder %s672_s13, %s666_s8 }
 0x1ca   : > { %p669_p7 = pneg %p668_p0  ;;  %p675_p9 = por %p674_p8, %p673_p3 }
 0x1cc   : > { %p676_p6 = pnand %p675_p9, %p669_p7 }
 0x1ce   : > { %679 = shalt.err (!%p676_p6)
}
 0x1cf   : > { %s680_s19 = scalar_lea.hbm %s923_s5, %s913_s26  ;;  %s684_s29 = scalar_lea.hbm %s972_s2, 384 }
 0x1d0   : > { %p681_p11 = scmp.ne.s32.totalorder %s923_s5, %s680_s19  ;;  %p685_p10 = scmp.lt.s32.totalorder %s923_s5, %s972_s2 }
 0x1d1   : > { %p686_p4 = scmp.lt.s32.totalorder %s684_s29, %s680_s19 }
 0x1d2   : > { %p682_p12 = pnand %p681_p11, %p466_p5 }
 0x1d3   : > { %p687_p13 = por %p686_p4, %p685_p10 }
 0x1d4   : > { %p683_p2 = pneg %p682_p12 }
 0x1d6   : > { %p688_p1 = pnand %p687_p13, %p683_p2 }
 0x1d8   : > { %691 = shalt.err (!%p688_p1)
}
 0x1d9   : > { %s743_s14 = smov 128   ;;  %s744_s25 = smov 8  }
 0x1da   : > { %369 = dma.vmem_to_hbm [thread:$0]  (%p466_p5), %s925_s6, %s913_s26, %s923_s5, %s344_s7, %s743_s14, %s743_s14, %s744_s25  }
 0x1db PF: > { %s378_s30 = sand.u32 1, %s722_s9   ;;  %p982_p0 = scmp.ne.s32.totalorder %s978_s22, 0 }
 0x1dc   : > { %p983_p7 = scmp.ge.s32.totalorder %s734_s12, 2  ;;  %s379_s3 = scalar_lea.sflag [#allocation4], %s378_s30 }
 0x1de   : > { %p557_p3 = pnand %p983_p7, %p982_p0 }
 0x1e0   : > { %p558_p8 = pneg %p557_p3 }
 0x1e2   : > { %717 = dma.done.wait (%p558_p8), %s379_s3, 256  }
 0x1e3   : > { %719 = vsyncadd (%p558_p8), %s379_s3, 4294967040  ;;  %p16_p9 = scmp.ge.s32.totalorder %s785_s15, 4   ;;  %s984_s9 = smov %s726_s10 }
 0x1e4   : > { %s985_s10 = smov %s730_s11  ;;  %s986_s11 = smov %s797_s18 }
 0x1e5   : > { %s987_s12 = smov %s785_s15  ;;  %18 = sbr.rel (!%p16_p9) target bundleno = 6 (0x6), region = 77 }
 0x1ea   :  { %384 = vsyncpa [#allocation3], 1 }
 0x1eb   :  { %386 = vsyncpa [#allocation3 + $0x1], 1 }
 0x1ec   :  { %387 = vsyncpa [#allocation6], 1 }
 0x1ed   :  { %388 = vsyncpa [#allocation4], 1 }
 0x1ee   :  { %390 = vsyncpa [#allocation4 + $0x1], 1 }

</bundles_post_ra>
